<compile_context>
chip_gen: v7x
topology: tpu7x:2x2x1
jax: 0.10.0
libtpu: 0.0.40
codegen_flags: <defaults>
</compile_context>

<pallas_src>
import functools

import jax
import jax.numpy as jnp
from jax.experimental import pallas as pl
from jax.experimental.pallas import tpu as pltpu

NEG_SLOPE = 0.01      # nn.LeakyReLU default
_TM_MAX = 32768       # max pixel lanes per tile (review: lift the old 8192 cap)


def _leaky_relu(x):
    # Valid for slope in [0, 1): max(x, slope*x) == leaky_relu(x).
    return jnp.maximum(x, NEG_SLOPE * x)


def conv1x1_mlp_kernel(x_ref, w1_ref, b1_ref, w2_ref, b2_ref, w3_ref, b3_ref,
                       o_ref, *, mxu_dtype):
    # x_ref: (C_in, tm)      -- channels on sublanes, pixels on lanes
    # w1: (hid, C_in)  w2: (hid, hid)  w3: (C_out, hid)   (PyTorch (out, in))
    # biases: (dim, 1) f32 so they broadcast over the pixel (lane) axis.
    # MXU operands optionally bf16; accumulation / bias / activation stay f32.
    x = x_ref[...].astype(mxu_dtype)
    h = jnp.dot(w1_ref[...].astype(mxu_dtype), x,
                preferred_element_type=jnp.float32) + b1_ref[...]
    h = _leaky_relu(h)
    h = jnp.dot(w2_ref[...].astype(mxu_dtype), h.astype(mxu_dtype),
                preferred_element_type=jnp.float32) + b2_ref[...]
    h = _leaky_relu(h)
    y = jnp.dot(w3_ref[...].astype(mxu_dtype), h.astype(mxu_dtype),
                preferred_element_type=jnp.float32) + b3_ref[...]
    o_ref[...] = y.astype(o_ref.dtype)


def _vmem_limit_bytes():
    """Per-generation scoped-VMEM limit (v7x has only 64 MiB physical)."""
    try:
        kind = jax.devices()[0].device_kind.lower()
    except Exception:  # pragma: no cover - defensive
        kind = ""
    if "v7" in kind or "7x" in kind:
        return 32 * 1024 * 1024
    if "v5" in kind or "v6" in kind:
        return 64 * 1024 * 1024          # 128 MiB physical on v5e/v6e
    return 32 * 1024 * 1024              # conservative default


def _choose_tm(N, HW, C_in, C_out, hid, x_bytes, out_bytes, vmem_limit_bytes):
    """Pick the pixel-tile width (lane axis) from the real VMEM budget.

    Counts: VMEM-resident weights/biases (conservatively x2-buffered), the
    double-buffered input/output pixel tiles at their HBM dtypes, and the live
    f32 intermediates of the 3-layer chain.  Clamps to lane multiples only
    after the budget check, and guarantees >= 2 grid blocks when N == 1 so a
    v7x megacore never idles a TensorCore.
    """
    if HW <= 128:
        return HW  # full-extent block; can't tile below one vreg lane row
    weight_elems = hid * C_in + hid * hid + C_out * hid + 2 * hid + C_out
    resident = 2 * 4 * weight_elems                      # f32, x2 buffers (worst case)
    budget = int(vmem_limit_bytes * 0.75) - resident     # headroom for compiler scratch
    per_pixel = (2 * C_in * x_bytes            # double-buffered input tile
                 + 2 * C_out * out_bytes       # double-buffered output tile
                 + 4 * (2 * hid + C_out))      # live f32 intermediates
    tm = max(budget // per_pixel, 128)
    hw_padded = pl.cdiv(HW, 128) * 128
    tm = min(tm, hw_padded, _TM_MAX)
    if tm >= 512:
        tm = (tm // 512) * 512                 # keep MXU lane dim fully fed
    else:
        tm = (tm // 128) * 128
    if N == 1 and tm >= HW:
        # Expose at least 2 pixel blocks for the 2 TensorCores on v7x.
        tm_split = pl.cdiv(pl.cdiv(HW, 2), 128) * 128
        tm = max(128, min(tm, tm_split))
    return tm


def _const_specs(hid, C_in, C_out, single_buffer):
    """BlockSpecs for the VMEM-resident weights/biases (constant index_map)."""
    shapes = [(hid, C_in), (hid, 1), (hid, hid), (hid, 1), (C_out, hid),
              (C_out, 1)]
    specs = []
    for s in shapes:
        if single_buffer:
            specs.append(pl.BlockSpec(s, lambda n, j: (0, 0),
                                      pipeline_mode=pl.Buffered(1)))
        else:
            specs.append(pl.BlockSpec(s, lambda n, j: (0, 0)))
    return specs


def conv2d1x1_pallas(x_nchw, params, *, tm=None, mxu_bf16=None):
    """x_nchw: (N, C_in, H, W) f32 or bf16.  params: dict of w1,b1,w2,b2,w3,b3
    with weights stored PyTorch-style as (out_features, in_features)."""
    N, C_in, H, W = x_nchw.shape
    w1, b1, w2, b2, w3, b3 = (params["w1"], params["b1"], params["w2"],
                              params["b2"], params["w3"], params["b3"])
    hid = w1.shape[0]
    C_out = w3.shape[0]
    HW = H * W

    out_dtype = x_nchw.dtype
    x_bytes = jnp.dtype(x_nchw.dtype).itemsize
    out_bytes = jnp.dtype(out_dtype).itemsize

    # bf16 MXU operands pay off once the channel dims are compute-relevant.
    if mxu_bf16 is None:
        mxu_bf16 = hid >= 128
    mxu_dtype = jnp.bfloat16 if mxu_bf16 else jnp.float32

    vmem_limit = _vmem_limit_bytes()
    if tm is None:
        tm = _choose_tm(N, HW, C_in, C_out, hid, x_bytes, out_bytes, vmem_limit)

    # NCHW -> (N, C_in, H*W): pure reshape, no data movement.
    x_flat = x_nchw.reshape(N, C_in, HW)

    b1r = b1.reshape(hid, 1).astype(jnp.float32)
    b2r = b2.reshape(hid, 1).astype(jnp.float32)
    b3r = b3.reshape(C_out, 1).astype(jnp.float32)

    grid = (N, pl.cdiv(HW, tm))

    flops = 2 * N * HW * (C_in * hid + hid * hid + hid * C_out)
    bytes_accessed = (N * HW * (C_in * x_bytes + C_out * out_bytes)
                      + 4 * (hid * C_in + hid * hid + C_out * hid
                             + 2 * hid + C_out))

    kernel = functools.partial(conv1x1_mlp_kernel, mxu_dtype=mxu_dtype)

    def build(single_buffer_weights):
        return pl.pallas_call(
            kernel,
            out_shape=jax.ShapeDtypeStruct((N, C_out, HW), out_dtype),
            grid_spec=pltpu.PrefetchScalarGridSpec(
                num_scalar_prefetch=0,
                grid=grid,
                in_specs=[
                    # x: batch dim squeezed; (C_in, tm) tile, pixels on lanes.
                    pl.BlockSpec((None, C_in, tm), lambda n, j: (n, 0, j)),
                ] + _const_specs(hid, C_in, C_out, single_buffer_weights),
                out_specs=pl.BlockSpec((None, C_out, tm),
                                       lambda n, j: (n, 0, j)),
            ),
            compiler_params=pltpu.CompilerParams(
                dimension_semantics=("parallel", "parallel"),
                vmem_limit_bytes=vmem_limit,
            ),
            cost_estimate=pl.CostEstimate(
                flops=flops, transcendentals=0, bytes_accessed=bytes_accessed),
        )

    args = (x_flat, w1, b1r, w2, b2r, w3, b3r)
    try:
        # Preferred: single-buffer the never-changing weights/biases.
        out_flat = build(True)(*args)
    except Exception:
        # Fallback for JAX builds that reject pipeline_mode=pl.Buffered(1).
        out_flat = build(False)(*args)

    # (N, C_out, H*W) -> (N, C_out, H, W): pure reshape.
    return out_flat.reshape(N, C_out, H, W)


def init_params(key, in_f, hidden_dim, out_f):
    """Deterministic init mimicking nn.Conv2d default U(-1/sqrt(fan_in), ...).

    Weights stored PyTorch-style as (out_features, in_features) so the kernel
    computes W @ x in the channels-first layout.
    """
    ks = jax.random.split(key, 6)

    def u(k, shape, fan_in):
        bound = 1.0 / jnp.sqrt(fan_in)
        return jax.random.uniform(k, shape, jnp.float32, -bound, bound)

    return {
        "w1": u(ks[0], (hidden_dim, in_f), in_f),
        "b1": u(ks[1], (hidden_dim,), in_f),
        "w2": u(ks[2], (hidden_dim, hidden_dim), hidden_dim),
        "b2": u(ks[3], (hidden_dim,), hidden_dim),
        "w3": u(ks[4], (out_f, hidden_dim), hidden_dim),
        "b3": u(ks[5], (out_f,), hidden_dim),
    }


def reference_forward(x_nchw, p):
    """Plain-JAX reference of the PyTorch module (NCHW, (out,in) weights)."""
    h = jnp.einsum("oc,nchw->nohw", p["w1"], x_nchw) + p["b1"][None, :, None, None]
    h = _leaky_relu(h)
    h = jnp.einsum("oc,nchw->nohw", p["w2"], h) + p["b2"][None, :, None, None]
    h = _leaky_relu(h)
    y = jnp.einsum("oc,nchw->nohw", p["w3"], h) + p["b3"][None, :, None, None]
    return y


if __name__ == "__main__":
    key = jax.random.PRNGKey(0)
    k_x, k_p = jax.random.split(key)

    N, in_f, Hs, Ws = 2, 4, 16, 16
    hidden_dim, out_f = 32, 4

    x = jax.random.normal(k_x, (N, in_f, Hs, Ws), jnp.float32)
    params = init_params(k_p, in_f, hidden_dim, out_f)

    y = conv2d1x1_pallas(x, params)
    y = jax.block_until_ready(y)

    y_ref = reference_forward(x, params)
    assert y.shape == (N, out_f, Hs, Ws)
    assert jnp.allclose(y, y_ref, atol=1e-5, rtol=1e-5)

    print("KERNEL_OK")
</pallas_src>

<mosaic_0001>
module attributes {stable_mosaic.version = 11 : i64} {
  func.func @conv1x1_mlp_kernel(%arg0: i32, %arg1: i32, %arg2: memref<1x4x256xf32, #tpu.memory_space<vmem>>, %arg3: memref<32x4xf32, #tpu.memory_space<vmem>>, %arg4: memref<32x1xf32, #tpu.memory_space<vmem>>, %arg5: memref<32x32xf32, #tpu.memory_space<vmem>>, %arg6: memref<32x1xf32, #tpu.memory_space<vmem>>, %arg7: memref<4x32xf32, #tpu.memory_space<vmem>>, %arg8: memref<4x1xf32, #tpu.memory_space<vmem>>, %arg9: memref<1x4x256xf32, #tpu.memory_space<vmem>>) attributes {dimension_semantics = [#tpu.dimension_semantics<parallel>, #tpu.dimension_semantics<parallel>], iteration_bounds = array<i64: 2, 1>, scalar_prefetch = 0 : i64, scratch_operands = 0 : i64, tpu.core_type = #tpu.core_type<tc>, window_params = [{transform_indices = @transform_0, window_bounds = array<i64: 1, 4, 256>}, {pipeline_mode = #tpu.pipeline_mode<synchronous>, transform_indices = @transform_1, window_bounds = array<i64: 32, 4>}, {pipeline_mode = #tpu.pipeline_mode<synchronous>, transform_indices = @transform_2, window_bounds = array<i64: 32, 1>}, {pipeline_mode = #tpu.pipeline_mode<synchronous>, transform_indices = @transform_3, window_bounds = array<i64: 32, 32>}, {pipeline_mode = #tpu.pipeline_mode<synchronous>, transform_indices = @transform_4, window_bounds = array<i64: 32, 1>}, {pipeline_mode = #tpu.pipeline_mode<synchronous>, transform_indices = @transform_5, window_bounds = array<i64: 4, 32>}, {pipeline_mode = #tpu.pipeline_mode<synchronous>, transform_indices = @transform_6, window_bounds = array<i64: 4, 1>}, {transform_indices = @transform_7, window_bounds = array<i64: 1, 4, 256>}]} {
    %c0 = arith.constant 0 : index
    %c0_0 = arith.constant 0 : index
    %c0_1 = arith.constant 0 : index
    %0 = vector.load %arg2[%c0, %c0_0, %c0_1] : memref<1x4x256xf32, #tpu.memory_space<vmem>>, vector<1x4x256xf32>
    %1 = vector.shape_cast %0 : vector<1x4x256xf32> to vector<4x256xf32>
    %c0_2 = arith.constant 0 : index
    %c0_3 = arith.constant 0 : index
    %2 = vector.load %arg3[%c0_2, %c0_3] : memref<32x4xf32, #tpu.memory_space<vmem>>, vector<32x4xf32>
    %cst = arith.constant dense<0.000000e+00> : vector<32x256xf32>
    %3 = tpu.matmul %2, %1, %cst {dimension_numbers = #tpu.dot_dimension_numbers<[1], [0], [0], [1], [0, 0, 1, 1], [], []>} : vector<32x4xf32>, vector<4x256xf32>, vector<32x256xf32> -> vector<32x256xf32>
    %c0_4 = arith.constant 0 : index
    %c0_5 = arith.constant 0 : index
    %4 = vector.load %arg4[%c0_4, %c0_5] : memref<32x1xf32, #tpu.memory_space<vmem>>, vector<32x1xf32>
    %5 = vector.broadcast %4 : vector<32x1xf32> to vector<32x256xf32>
    %6 = arith.addf %3, %5 : vector<32x256xf32>
    %cst_6 = arith.constant 0.00999999977 : f32
    %7 = vector.broadcast %cst_6 : f32 to vector<32x256xf32>
    %8 = arith.mulf %7, %6 : vector<32x256xf32>
    %9 = arith.maximumf %6, %8 : vector<32x256xf32>
    %c0_7 = arith.constant 0 : index
    %c0_8 = arith.constant 0 : index
    %10 = vector.load %arg5[%c0_7, %c0_8] : memref<32x32xf32, #tpu.memory_space<vmem>>, vector<32x32xf32>
    %cst_9 = arith.constant dense<0.000000e+00> : vector<32x256xf32>
    %11 = tpu.matmul %10, %9, %cst_9 {dimension_numbers = #tpu.dot_dimension_numbers<[1], [0], [0], [1], [0, 0, 1, 1], [], []>} : vector<32x32xf32>, vector<32x256xf32>, vector<32x256xf32> -> vector<32x256xf32>
    %c0_10 = arith.constant 0 : index
    %c0_11 = arith.constant 0 : index
    %12 = vector.load %arg6[%c0_10, %c0_11] : memref<32x1xf32, #tpu.memory_space<vmem>>, vector<32x1xf32>
    %13 = vector.broadcast %12 : vector<32x1xf32> to vector<32x256xf32>
    %14 = arith.addf %11, %13 : vector<32x256xf32>
    %cst_12 = arith.constant 0.00999999977 : f32
    %15 = vector.broadcast %cst_12 : f32 to vector<32x256xf32>
    %16 = arith.mulf %15, %14 : vector<32x256xf32>
    %17 = arith.maximumf %14, %16 : vector<32x256xf32>
    %c0_13 = arith.constant 0 : index
    %c0_14 = arith.constant 0 : index
    %18 = vector.load %arg7[%c0_13, %c0_14] : memref<4x32xf32, #tpu.memory_space<vmem>>, vector<4x32xf32>
    %cst_15 = arith.constant dense<0.000000e+00> : vector<4x256xf32>
    %19 = tpu.matmul %18, %17, %cst_15 {dimension_numbers = #tpu.dot_dimension_numbers<[1], [0], [0], [1], [0, 0, 1, 1], [], []>} : vector<4x32xf32>, vector<32x256xf32>, vector<4x256xf32> -> vector<4x256xf32>
    %c0_16 = arith.constant 0 : index
    %c0_17 = arith.constant 0 : index
    %20 = vector.load %arg8[%c0_16, %c0_17] : memref<4x1xf32, #tpu.memory_space<vmem>>, vector<4x1xf32>
    %21 = vector.broadcast %20 : vector<4x1xf32> to vector<4x256xf32>
    %22 = arith.addf %19, %21 : vector<4x256xf32>
    %c0_18 = arith.constant 0 : index
    %c0_19 = arith.constant 0 : index
    %c0_20 = arith.constant 0 : index
    %23 = vector.load %arg9[%c0_18, %c0_19, %c0_20] : memref<1x4x256xf32, #tpu.memory_space<vmem>>, vector<1x4x256xf32>
    %24 = vector.shape_cast %23 : vector<1x4x256xf32> to vector<4x256xf32>
    %25 = vector.shape_cast %22 : vector<4x256xf32> to vector<1x4x256xf32>
    tpu.vector_store %arg9[%c0_18, %c0_19, %c0_20], %25 {strides = array<i32>} : memref<1x4x256xf32, #tpu.memory_space<vmem>>, vector<1x4x256xf32>,
    return
  }
  func.func @transform_0(%arg0: i32, %arg1: i32) -> (i32, i32, i32) {
    %c0_i32 = arith.constant 0 : i32
    %c0_i32_0 = arith.constant 0 : i32
    return %arg0, %c0_i32, %arg1 : i32, i32, i32
  }
  func.func @transform_1(%arg0: i32, %arg1: i32) -> (i32, i32) {
    %c0_i32 = arith.constant 0 : i32
    %c0_i32_0 = arith.constant 0 : i32
    %c0_i32_1 = arith.constant 0 : i32
    return %c0_i32, %c0_i32_0 : i32, i32
  }
  func.func @transform_2(%arg0: i32, %arg1: i32) -> (i32, i32) {
    %c0_i32 = arith.constant 0 : i32
    %c0_i32_0 = arith.constant 0 : i32
    %c0_i32_1 = arith.constant 0 : i32
    return %c0_i32, %c0_i32_0 : i32, i32
  }
  func.func @transform_3(%arg0: i32, %arg1: i32) -> (i32, i32) {
    %c0_i32 = arith.constant 0 : i32
    %c0_i32_0 = arith.constant 0 : i32
    %c0_i32_1 = arith.constant 0 : i32
    return %c0_i32, %c0_i32_0 : i32, i32
  }
  func.func @transform_4(%arg0: i32, %arg1: i32) -> (i32, i32) {
    %c0_i32 = arith.constant 0 : i32
    %c0_i32_0 = arith.constant 0 : i32
    %c0_i32_1 = arith.constant 0 : i32
    return %c0_i32, %c0_i32_0 : i32, i32
  }
  func.func @transform_5(%arg0: i32, %arg1: i32) -> (i32, i32) {
    %c0_i32 = arith.constant 0 : i32
    %c0_i32_0 = arith.constant 0 : i32
    %c0_i32_1 = arith.constant 0 : i32
    return %c0_i32, %c0_i32_0 : i32, i32
  }
  func.func @transform_6(%arg0: i32, %arg1: i32) -> (i32, i32) {
    %c0_i32 = arith.constant 0 : i32
    %c0_i32_0 = arith.constant 0 : i32
    %c0_i32_1 = arith.constant 0 : i32
    return %c0_i32, %c0_i32_0 : i32, i32
  }
  func.func @transform_7(%arg0: i32, %arg1: i32) -> (i32, i32, i32) {
    %c0_i32 = arith.constant 0 : i32
    %c0_i32_0 = arith.constant 0 : i32
    return %arg0, %c0_i32, %arg1 : i32, i32, i32
  }
}

module attributes {stable_mosaic.version = 11 : i64} {
  func.func @conv1x1_mlp_kernel(%arg0: i32, %arg1: i32, %arg2: memref<1x4x256xf32, #tpu.memory_space<vmem>>, %arg3: memref<32x4xf32, #tpu.memory_space<vmem>>, %arg4: memref<32x1xf32, #tpu.memory_space<vmem>>, %arg5: memref<32x32xf32, #tpu.memory_space<vmem>>, %arg6: memref<32x1xf32, #tpu.memory_space<vmem>>, %arg7: memref<4x32xf32, #tpu.memory_space<vmem>>, %arg8: memref<4x1xf32, #tpu.memory_space<vmem>>, %arg9: memref<1x4x256xf32, #tpu.memory_space<vmem>>) attributes {dimension_semantics = [#tpu.dimension_semantics<parallel>, #tpu.dimension_semantics<parallel>], iteration_bounds = array<i64: 2, 1>, scalar_prefetch = 0 : i64, scratch_operands = 0 : i64, tpu.core_type = #tpu.core_type<tc>, window_params = [{transform_indices = @transform_0, window_bounds = array<i64: 1, 4, 256>}, {pipeline_mode = #tpu.pipeline_mode<synchronous>, transform_indices = @transform_1, window_bounds = array<i64: 32, 4>}, {pipeline_mode = #tpu.pipeline_mode<synchronous>, transform_indices = @transform_2, window_bounds = array<i64: 32, 1>}, {pipeline_mode = #tpu.pipeline_mode<synchronous>, transform_indices = @transform_3, window_bounds = array<i64: 32, 32>}, {pipeline_mode = #tpu.pipeline_mode<synchronous>, transform_indices = @transform_4, window_bounds = array<i64: 32, 1>}, {pipeline_mode = #tpu.pipeline_mode<synchronous>, transform_indices = @transform_5, window_bounds = array<i64: 4, 32>}, {pipeline_mode = #tpu.pipeline_mode<synchronous>, transform_indices = @transform_6, window_bounds = array<i64: 4, 1>}, {transform_indices = @transform_7, window_bounds = array<i64: 1, 4, 256>}]} {
    %c0 = arith.constant 0 : index
    %c0_0 = arith.constant 0 : index
    %c0_1 = arith.constant 0 : index
    %0 = vector.load %arg2[%c0, %c0_0, %c0_1] : memref<1x4x256xf32, #tpu.memory_space<vmem>>, vector<1x4x256xf32>
    %1 = vector.shape_cast %0 : vector<1x4x256xf32> to vector<4x256xf32>
    %c0_2 = arith.constant 0 : index
    %c0_3 = arith.constant 0 : index
    %2 = vector.load %arg3[%c0_2, %c0_3] : memref<32x4xf32, #tpu.memory_space<vmem>>, vector<32x4xf32>
    %cst = arith.constant dense<0.000000e+00> : vector<32x256xf32>
    %3 = tpu.matmul %2, %1, %cst {dimension_numbers = #tpu.dot_dimension_numbers<[1], [0], [0], [1], [0, 0, 1, 1], [], []>} : vector<32x4xf32>, vector<4x256xf32>, vector<32x256xf32> -> vector<32x256xf32>
    %c0_4 = arith.constant 0 : index
    %c0_5 = arith.constant 0 : index
    %4 = vector.load %arg4[%c0_4, %c0_5] : memref<32x1xf32, #tpu.memory_space<vmem>>, vector<32x1xf32>
    %5 = vector.broadcast %4 : vector<32x1xf32> to vector<32x256xf32>
    %6 = arith.addf %3, %5 : vector<32x256xf32>
    %cst_6 = arith.constant 0.00999999977 : f32
    %7 = vector.broadcast %cst_6 : f32 to vector<32x256xf32>
    %8 = arith.mulf %7, %6 : vector<32x256xf32>
    %9 = arith.maximumf %6, %8 : vector<32x256xf32>
    %c0_7 = arith.constant 0 : index
    %c0_8 = arith.constant 0 : index
    %10 = vector.load %arg5[%c0_7, %c0_8] : memref<32x32xf32, #tpu.memory_space<vmem>>, vector<32x32xf32>
    %cst_9 = arith.constant dense<0.000000e+00> : vector<32x256xf32>
    %11 = tpu.matmul %10, %9, %cst_9 {dimension_numbers = #tpu.dot_dimension_numbers<[1], [0], [0], [1], [0, 0, 1, 1], [], []>} : vector<32x32xf32>, vector<32x256xf32>, vector<32x256xf32> -> vector<32x256xf32>
    %c0_10 = arith.constant 0 : index
    %c0_11 = arith.constant 0 : index
    %12 = vector.load %arg6[%c0_10, %c0_11] : memref<32x1xf32, #tpu.memory_space<vmem>>, vector<32x1xf32>
    %13 = vector.broadcast %12 : vector<32x1xf32> to vector<32x256xf32>
    %14 = arith.addf %11, %13 : vector<32x256xf32>
    %cst_12 = arith.constant 0.00999999977 : f32
    %15 = vector.broadcast %cst_12 : f32 to vector<32x256xf32>
    %16 = arith.mulf %15, %14 : vector<32x256xf32>
    %17 = arith.maximumf %14, %16 : vector<32x256xf32>
    %c0_13 = arith.constant 0 : index
    %c0_14 = arith.constant 0 : index
    %18 = vector.load %arg7[%c0_13, %c0_14] : memref<4x32xf32, #tpu.memory_space<vmem>>, vector<4x32xf32>
    %cst_15 = arith.constant dense<0.000000e+00> : vector<4x256xf32>
    %19 = tpu.matmul %18, %17, %cst_15 {dimension_numbers = #tpu.dot_dimension_numbers<[1], [0], [0], [1], [0, 0, 1, 1], [], []>} : vector<4x32xf32>, vector<32x256xf32>, vector<4x256xf32> -> vector<4x256xf32>
    %c0_16 = arith.constant 0 : index
    %c0_17 = arith.constant 0 : index
    %20 = vector.load %arg8[%c0_16, %c0_17] : memref<4x1xf32, #tpu.memory_space<vmem>>, vector<4x1xf32>
    %21 = vector.broadcast %20 : vector<4x1xf32> to vector<4x256xf32>
    %22 = arith.addf %19, %21 : vector<4x256xf32>
    %c0_18 = arith.constant 0 : index
    %c0_19 = arith.constant 0 : index
    %c0_20 = arith.constant 0 : index
    %23 = vector.load %arg9[%c0_18, %c0_19, %c0_20] : memref<1x4x256xf32, #tpu.memory_space<vmem>>, vector<1x4x256xf32>
    %24 = vector.shape_cast %23 : vector<1x4x256xf32> to vector<4x256xf32>
    %25 = vector.shape_cast %22 : vector<4x256xf32> to vector<1x4x256xf32>
    tpu.vector_store %arg9[%c0_18, %c0_19, %c0_20], %25 {strides = array<i32>} : memref<1x4x256xf32, #tpu.memory_space<vmem>>, vector<1x4x256xf32>,
    return
  }
  func.func @transform_0(%arg0: i32, %arg1: i32) -> (i32, i32, i32) {
    %c0_i32 = arith.constant 0 : i32
    %c0_i32_0 = arith.constant 0 : i32
    return %arg0, %c0_i32, %arg1 : i32, i32, i32
  }
  func.func @transform_1(%arg0: i32, %arg1: i32) -> (i32, i32) {
    %c0_i32 = arith.constant 0 : i32
    %c0_i32_0 = arith.constant 0 : i32
    %c0_i32_1 = arith.constant 0 : i32
    return %c0_i32, %c0_i32_0 : i32, i32
  }
  func.func @transform_2(%arg0: i32, %arg1: i32) -> (i32, i32) {
    %c0_i32 = arith.constant 0 : i32
    %c0_i32_0 = arith.constant 0 : i32
    %c0_i32_1 = arith.constant 0 : i32
    return %c0_i32, %c0_i32_0 : i32, i32
  }
  func.func @transform_3(%arg0: i32, %arg1: i32) -> (i32, i32) {
    %c0_i32 = arith.constant 0 : i32
    %c0_i32_0 = arith.constant 0 : i32
    %c0_i32_1 = arith.constant 0 : i32
    return %c0_i32, %c0_i32_0 : i32, i32
  }
  func.func @transform_4(%arg0: i32, %arg1: i32) -> (i32, i32) {
    %c0_i32 = arith.constant 0 : i32
    %c0_i32_0 = arith.constant 0 : i32
    %c0_i32_1 = arith.constant 0 : i32
    return %c0_i32, %c0_i32_0 : i32, i32
  }
  func.func @transform_5(%arg0: i32, %arg1: i32) -> (i32, i32) {
    %c0_i32 = arith.constant 0 : i32
    %c0_i32_0 = arith.constant 0 : i32
    %c0_i32_1 = arith.constant 0 : i32
    return %c0_i32, %c0_i32_0 : i32, i32
  }
  func.func @transform_6(%arg0: i32, %arg1: i32) -> (i32, i32) {
    %c0_i32 = arith.constant 0 : i32
    %c0_i32_0 = arith.constant 0 : i32
    %c0_i32_1 = arith.constant 0 : i32
    return %c0_i32, %c0_i32_0 : i32, i32
  }
  func.func @transform_7(%arg0: i32, %arg1: i32) -> (i32, i32, i32) {
    %c0_i32 = arith.constant 0 : i32
    %c0_i32_0 = arith.constant 0 : i32
    return %arg0, %c0_i32, %arg1 : i32, i32, i32
  }
}

</mosaic_0001>

<bundles_post_ra>
// kernel: tpu_custom_call.1
= control target key start
LH: loop header
LB: loop body
LE: loop exit
PB: predicated region body
PF: predicated region fallthrough
CT: control target
= control target key end

     0   :  { %12 = vsyncpa [#allocation3], 0  ;;  %s1196_s0 = inlined_call_operand.vmem [shape: f32[2,4,256], index: 0, kind: input, shape index: {}]   ;;  %s1197_s1 = inlined_call_operand.vmem [shape: f32[32,4], index: 1, kind: input, shape index: {}]   ;;  %s1198_s2 = inlined_call_operand.vmem [shape: f32[32,1], index: 2, kind: input, shape index: {}]   ;;  %s1199_s3 = inlined_call_operand.vmem [shape: f32[32,32], index: 3, kind: input, shape index: {}]   ;;  %s1200_s4 = inlined_call_operand.vmem [shape: f32[32,1], index: 4, kind: input, shape index: {}]   ;;  %s1201_s5 = inlined_call_operand.vmem [shape: f32[4,32], index: 5, kind: input, shape index: {}]   ;;  %s1202_s6 = inlined_call_operand.vmem [shape: f32[4,1], index: 6, kind: input, shape index: {}]   ;;  %s1203_s7 = inlined_call_operand.hbm [shape: f32[2,4,256], index: 7, kind: output, shape index: {}]  }
   0x1   :  { %14 = vsyncpa [#allocation3 + $0x1], 0  ;;  %s1012_s24 = smov 0   ;;  %s1014_s25 = smov 0  }
   0x2   :  { %s1016_s26 = smov 0   ;;  %s1018_s27 = smov 0  }
   0x3   :  { %s1020_s28 = smov 0   ;;  %s1022_s29 = smov 0  }
   0x4 LB: > { %s787_s30 = sadd.s32 4294967295, %s967_s29   ;;  %s788_s8 = sadd.s32 4294967294, %s967_s29   ;;  %s967_s29 = sphi %s1022_s29, %s20_s29   ;;  %s963_s28 = sphi %s1020_s28, %s1210_s28   ;;  %s959_s27 = sphi %s1018_s27, %s1209_s27   ;;  %s955_s26 = sphi %s1016_s26, %s1208_s26   ;;  %s951_s25 = sphi %s1014_s25, %s1207_s25   ;;  %s947_s24 = sphi %s1012_s24, %s1206_s24  }
   0x5   : > { %s32_s9 = sadd.s32 1, %s963_s28  ;;  %s195_s10 = sadd.s32 1, %s955_s26 }
   0x6   : > { %p34_p0 = scmp.ge.s32.totalorder %s32_s9, 2  ;;  %p205_p1 = scmp.ne.s32.totalorder %s955_s26, %s951_s25 }
   0x7   : > { %p206_p2 = scmp.eq.s32.totalorder %s787_s30, 1  ;;  %p211_p3 = scmp.ne.s32.totalorder %s951_s25, %s947_s24 }
   0x8   : > { %s1212_s9 = smov (%p34_p0, %s32_s9), 0  ;;  %p212_p5 = scmp.eq.s32.totalorder %s788_s8, 1 }
   0x9   : > { %p1052_p4 = por %p206_p2, %p205_p1  ;;  %s190_s12 = ssub.s32 %s963_s28, %s1212_s9 }
   0xa   : > { %p791_p6 = scmp.ge.s32.totalorder %s967_s29, 1  ;;  %p193_p7 = scmp.eq.s32.totalorder %s190_s12, 0 }
   0xb   : > { %p1059_p8 = por %p212_p5, %p211_p3  ;;  %p261_p9 = scmp.lt.s32.totalorder %s967_s29, 3 }
   0xc   : > { %s1065_s14 = scalar_select %p193_p7, %s955_s26, %s195_s10  }
   0xd   : > { %p262_p10 = pnand %p791_p6, %p261_p9 }
   0xe   : > { %p298_p11 = scmp.lt.s32.totalorder (!%p262_p10), %s959_s27, 1  ;;  %v969_v0 = vmov (!%p262_p10), 0.0   ;;  %v313_v1 = vld [vmem:[%s1198_s2] sm:$0xff] (!%p262_p10)  ;;  %v970_v2 = vmov (!%p262_p10), 0   ;;  %v315_v3 = vld [vmem:[%s1198_s2 + $0x10] sm:$0xff] (!%p262_p10)  ;;  %v314_v4 = vld [vmem:[%s1198_s2 + $0x8] sm:$0xff] (!%p262_p10) }
   0xf   : > { %265 = sbr.rel (%p262_p10) target bundleno = 736 (0x2e0), region = 48  ;;  %421 = vmatprep.mubr.f32.mxu0 (!%p262_p10), %v969_v0  ;;  %567 = vmatprep.mubr.f32.mxu1 (!%p262_p10), %v969_v0  ;;  %v316_v5 = vld [vmem:[%s1198_s2 + $0x18] sm:$0xff] (!%p262_p10)  ;;  %vm352_vm0 = vcmask (!%p262_p10), 1043456   ;;  %v309_v8 = vld [vmem:[%s1197_s1] sm:$0xff] (!%p262_p10)  ;;  %vm339_vm1 = vcmask (!%p262_p10), 31744   ;;  %v467_v10 = vld [vmem:[%s1200_s4 + $0x8] sm:$0xff] (!%p262_p10) }
  0x10   : > { %886 = vset.pattern.permute.xlu0 (!%p262_p10), %v970_v2  ;;  %887 = vset.pattern.permute.xlu1 (!%p262_p10), %v970_v2  ;;  %v466_v9 = vld [vmem:[%s1200_s4] sm:$0xff] (!%p262_p10)  ;;  %v310_v11 = vld [vmem:[%s1197_s1 + $0x8] sm:$0xff] (!%p262_p10)  ;;  %v468_v12 = vld [vmem:[%s1200_s4 + $0x10] sm:$0xff] (!%p262_p10)  ;;  %vm490_vm2 = vcmask (!%p262_p10), 261120   ;;  %s812_s19 = sshll.u32 (!%p262_p10), %s959_s27, 7 }
  0x11   : > { %319 = vperm.xlu0 (!%p262_p10), %886, %v313_v1   ;;  %329 = vperm.xlu1 (!%p262_p10), %887, %v315_v3   ;;  %v469_v13 = vld [vmem:[%s1200_s4 + $0x18] sm:$0xff] (!%p262_p10)  ;;  %v311_v14 = vld [vmem:[%s1197_s1 + $0x10] sm:$0xff] (!%p262_p10)  ;;  %v609_v15 = vld [vmem:[%s1202_s6] sm:$0xf] (!%p262_p10)  ;;  %s1149_s30 = scalar_lea.hbm (!%p262_p10), %s1203_s7, %s812_s19 }
  0x12   : > { %v312_v16 = vld [vmem:[%s1197_s1 + $0x18] sm:$0xff] (!%p262_p10)  ;;  %v462_v57 = vld [vmem:[%s1199_s3] sm:$0xff] (!%p262_p10)  ;;  %v463_v58 = vld [vmem:[%s1199_s3 + $0x8] sm:$0xff] (!%p262_p10) }
  0x13   : > { %v464_v59 = vld [vmem:[%s1199_s3 + $0x10] sm:$0xff] (!%p262_p10)  ;;  %v465_v60 = vld [vmem:[%s1199_s3 + $0x18] sm:$0xff] (!%p262_p10) }
  0x15   : > { %324 = vperm.xlu0 (!%p262_p10), %886, %v314_v4   ;;  %334 = vperm.xlu1 (!%p262_p10), %887, %v316_v5  }
  0x16   : > { %s299_s17 = scalar_select %p298_p11, %s959_s27, 1 }
  0x17   : > { %s971_s27 = smov [#allocation2]  }
  0x18   : > { %s811_s20 = sshll.u32 %s299_s17, 3  ;;  %s294_s17 = sand.u32 1, %s951_s25  }
  0x19   : > { %s305_s12 = scalar_lea.vmem %s1196_s0, %s811_s20  ;;  %472 = vperm.xlu0 %886, %v466_v9   ;;  %477 = vperm.xlu1 %887, %v467_v10   ;;  %s792_s18 = sshll.u32 %s294_s17, 3 }
  0x1a   : > { %v308_v6 = vld [vmem:[%s305_s12] sm:$0xff]  ;;  %s296_s21 = scalar_lea.vmem [#allocation2], %s792_s18  ;;  %s695_s8 = scalar_lea.sflag [#allocation3], %s294_s17 }
  0x1b   : > { %v338_v7 = vcombine.high %v308_v6, %v308_v6  ;;  %s711_s20 = sshll.u32 %s296_s21, 4  ;;  %s893_s12 = sshll.u32 %s971_s27, 4  ;;  %s1151_s20 = int_to_ptr.vmem [resolvable:$true] %s711_s20  ;;  %s894_s12 = int_to_ptr.vmem [resolvable:$false] %s893_s12 }
  0x1c   : > { %s889_s10 = scalar_lea.vmem %s1151_s20, 128  ;;  %s895_s15 = scalar_lea.vmem %s894_s12, 256 }
  0x1d   : > { %795 = vmatprep.subr.msk.mxu0 %vm352_vm0, %v338_v7  ;;  %482 = vperm.xlu0 %886, %v468_v12   ;;  %p890_p12 = scmp.ne.s32.totalorder %s1151_s20, %s889_s10  ;;  %p896_p1 = scmp.lt.s32.totalorder %s1151_s20, %s894_s12 }
  0x1e   : > { %796 = vmatpush1.msk.msra.mxu0 %vm352_vm0, %v308_v6  ;;  %487 = vperm.xlu1 %887, %v469_v13   ;;  %p897_p2 = scmp.lt.s32.totalorder %s895_s15, %s889_s10 }
  0x1f   : > { %797 = vmatmul.mubr.msk.f32.vlgmr.msra.gmra.mrb[0].mxu0 %vm339_vm1, %v309_v8  ;;  %p891_p13 = pnand %p890_p12, %p1052_p4 }
  0x20   : > { %427 = vmatprep.mubr.f32.mxu0 %v969_v0  ;;  %p898_p3 = por %p897_p2, %p896_p1 }
  0x21   : > { %612 = vperm.xlu0 %886, %v609_v15   ;;  %p892_p0 = pneg %p891_p13 }
  0x23   : > { %798 = vmatmul.mubr.msk.f32.gmra.mrb[2].mxu0 %vm339_vm1, %v310_v11  ;;  %p899_p5 = pnand %p898_p3, %p892_p0 }
  0x24   : > { %433 = vmatprep.mubr.f32.mxu0 %v969_v0 }
  0x27   : > { %799 = vmatmul.mubr.msk.f32.gmra.mrb[4].mxu0 %vm339_vm1, %v311_v14 }
  0x28   : > { %439 = vmatprep.mubr.f32.mxu0 %v969_v0 }
  0x2b   : > { %800 = vmatmul.mubr.msk.f32.gmra.mrb[6].mxu0 %vm339_vm1, %v312_v16 }
  0x2c   : > { %682 = vmatprep.mubr.f32.mxu0 %v969_v0 }
  0x90   : > { %v320_v17 = vpop.permute.xlu0 %319  ;;  %v330_v27 = vpop.permute.xlu1 %329 }
  0x94   : > { %v325_v22 = vpop.permute.xlu0 %324  ;;  %v335_v41 = vpop.permute.xlu1 %334 }
  0x98   : > { %v473_v61 = vpop.permute.xlu0 %472  ;;  %v478_v3 = vpop.permute.xlu1 %477 }
  0xf2   : > { %v423_v18 = vpop.f32.mrb[0].mxu0 }
  0xf3   : > { %v424_v19 = vadd.f32 %v423_v18, %v320_v17  ;;  %v425_v20 = vpop.f32.mrb[1].mxu0 }
  0xf4   : > { %v426_v21 = vadd.f32 %v425_v20, %v320_v17 }
  0xf5   : > { %v446_v24 = vmul.f32 0.01, %v424_v19 }
  0xf6   : > { %v429_v23 = vpop.f32.mrb[2].mxu0  ;;  %v447_v28 = vmul.f32 0.01, %v426_v21 }
  0xf7   : > { %v430_v25 = vadd.f32 %v429_v23, %v325_v22  ;;  %v431_v26 = vpop.f32.mrb[3].mxu0  ;;  %v454_v33 = vmax.f32 %v424_v19, %v446_v24 }
  0xf8   : > { %v432_v29 = vadd.f32 %v431_v26, %v325_v22  ;;  %v455_v38 = vmax.f32 %v426_v21, %v447_v28  ;;  %v488_v21 = vpop.permute.xlu1 %487 }
  0xf9   : > { %v448_v30 = vmul.f32 0.01, %v430_v25 }
  0xfa   : > { %v449_v31 = vmul.f32 0.01, %v432_v29  ;;  %v435_v32 = vpop.f32.mrb[4].mxu0 }
  0xfb   : > { %v456_v34 = vmax.f32 %v430_v25, %v448_v30  ;;  %v436_v35 = vadd.f32 %v435_v32, %v330_v27  ;;  %v437_v36 = vpop.f32.mrb[5].mxu0 }
  0xfc   : > { %v438_v37 = vadd.f32 %v437_v36, %v330_v27  ;;  %v457_v39 = vmax.f32 %v432_v29, %v449_v31 }
  0xfd   : > { %v815_v40 = vpack.c.bf16 %v456_v34, %v454_v33  ;;  %v450_v44 = vmul.f32 0.01, %v436_v35 }
  0xfe   : > { %v441_v42 = vpop.f32.mrb[6].mxu0  ;;  %v813_v43 = vpack.c.bf16 %v457_v39, %v455_v38  ;;  %v451_v47 = vmul.f32 0.01, %v438_v37 }
  0xff   : > { %v442_v45 = vadd.f32 %v441_v42, %v335_v41  ;;  %v443_v46 = vpop.f32.mrb[7].mxu0  ;;  %v458_v51 = vmax.f32 %v436_v35, %v450_v44 }
 0x100   : > { %v444_v48 = vadd.f32 %v443_v46, %v335_v41  ;;  %814 = vmatprep.subr.bf16.mxu1 %v813_v43  ;;  %v459_v53 = vmax.f32 %v438_v37, %v451_v47  ;;  %v608_v37 = vld [vmem:[%s1201_s5] sm:$0xf] }
 0x101   : > { %v452_v49 = vmul.f32 0.01, %v442_v45  ;;  %816 = vmatpush1.bf16.msra.mxu1 %v815_v40 }
 0x102   : > { %v453_v50 = vmul.f32 0.01, %v444_v48 }
 0x103   : > { %v460_v52 = vmax.f32 %v442_v45, %v452_v49 }
 0x104   : > { %v461_v54 = vmax.f32 %v444_v48, %v453_v50 }
 0x105   : > { %v819_v55 = vpack.c.bf16 %v460_v52, %v458_v51 }
 0x106   : > { %v817_v56 = vpack.c.bf16 %v461_v54, %v459_v53 }
 0x108   : > { %818 = vmatprep.subr.bf16.mxu1 %v817_v56 }
 0x109   : > { %820 = vmatpush1.bf16.msra.mxu1 %v819_v55 }
 0x10c   : > { %801 = vmatmul.mubr.msk.f32.vlgmr.msra.gmra.mrb[0].mxu1 %vm490_vm2, %v462_v57 }
 0x10d   : > { %573 = vmatprep.mubr.f32.mxu1 %v969_v0 }
 0x110   : > { %802 = vmatmul.mubr.msk.f32.gmra.mrb[2].mxu1 %vm490_vm2, %v463_v58 }
 0x111   : > { %579 = vmatprep.mubr.f32.mxu1 %v969_v0 }
 0x114   : > { %803 = vmatmul.mubr.msk.f32.gmra.mrb[4].mxu1 %vm490_vm2, %v464_v59 }
 0x115   : > { %585 = vmatprep.mubr.f32.mxu1 %v969_v0  ;;  %v483_v0 = vpop.permute.xlu0 %482 }
 0x118   : > { %804 = vmatmul.mubr.msk.f32.gmra.mrb[6].mxu1 %vm490_vm2, %v465_v60 }
 0x119   : > { %v613_v38 = vpop.permute.xlu0 %612 }
 0x1df   : > { %v569_v62 = vpop.f32.mrb[0].mxu1 }
 0x1e0   : > { %v570_v63 = vadd.f32 %v569_v62, %v473_v61  ;;  %v571_v1 = vpop.f32.mrb[1].mxu1 }
 0x1e1   : > { %v572_v2 = vadd.f32 %v571_v1, %v473_v61 }
 0x1e2   : > { %v592_v5 = vmul.f32 0.01, %v570_v63 }
 0x1e3   : > { %v575_v4 = vpop.f32.mrb[2].mxu1  ;;  %v593_v8 = vmul.f32 0.01, %v572_v2 }
 0x1e4   : > { %v576_v6 = vadd.f32 %v575_v4, %v478_v3  ;;  %v577_v7 = vpop.f32.mrb[3].mxu1  ;;  %v600_v13 = vmax.f32 %v570_v63, %v592_v5 }
 0x1e5   : > { %v578_v9 = vadd.f32 %v577_v7, %v478_v3  ;;  %v601_v17 = vmax.f32 %v572_v2, %v593_v8 }
 0x1e6   : > { %v594_v10 = vmul.f32 0.01, %v576_v6 }
 0x1e7   : > { %v595_v11 = vmul.f32 0.01, %v578_v9  ;;  %v581_v12 = vpop.f32.mrb[4].mxu1 }
 0x1e8   : > { %v602_v14 = vmax.f32 %v576_v6, %v594_v10  ;;  %v582_v15 = vadd.f32 %v581_v12, %v483_v0  ;;  %v583_v16 = vpop.f32.mrb[5].mxu1 }
 0x1e9   : > { %v603_v18 = vmax.f32 %v578_v9, %v595_v11  ;;  %v584_v19 = vadd.f32 %v583_v16, %v483_v0 }
 0x1ea   : > { %v823_v20 = vpack.c.bf16 %v602_v14, %v600_v13  ;;  %v596_v24 = vmul.f32 0.01, %v582_v15 }
 0x1eb   : > { %v587_v22 = vpop.f32.mrb[6].mxu1  ;;  %v821_v23 = vpack.c.bf16 %v603_v18, %v601_v17  ;;  %v597_v27 = vmul.f32 0.01, %v584_v19 }
 0x1ec   : > { %v588_v25 = vadd.f32 %v587_v22, %v488_v21  ;;  %v589_v26 = vpop.f32.mrb[7].mxu1  ;;  %v604_v31 = vmax.f32 %v582_v15, %v596_v24 }
 0x1ed   : > { %v590_v28 = vadd.f32 %v589_v26, %v488_v21  ;;  %822 = vmatprep.subr.bf16.mxu0 %v821_v23  ;;  %v605_v33 = vmax.f32 %v584_v19, %v597_v27 }
 0x1ee   : > { %v598_v29 = vmul.f32 0.01, %v588_v25  ;;  %824 = vmatpush1.bf16.msra.mxu0 %v823_v20 }
 0x1ef   : > { %v599_v30 = vmul.f32 0.01, %v590_v28 }
 0x1f0   : > { %v606_v32 = vmax.f32 %v588_v25, %v598_v29 }
 0x1f1   : > { %v607_v34 = vmax.f32 %v590_v28, %v599_v30 }
 0x1f2   : > { %v827_v35 = vpack.c.bf16 %v606_v32, %v604_v31 }
 0x1f3   : > { %v825_v36 = vpack.c.bf16 %v607_v34, %v605_v33 }
 0x1f5   : > { %826 = vmatprep.subr.bf16.mxu0 %v825_v36 }
 0x1f6   : > { %828 = vmatpush1.bf16.msra.mxu0 %v827_v35 }
 0x1f9   : > { %805 = vmatmul.mubr.msk.f32.vlgmr.msra.gmra.mrb[8].mxu0 %vm490_vm2, %v608_v37 }
 0x2cc   : > { %v684_v39 = vpop.f32.mrb[8].mxu0 }
 0x2cd   : > { %v685_v40 = vadd.f32 %v684_v39, %v613_v38  ;;  %v686_v41 = vpop.f32.mrb[9].mxu0 }
 0x2ce   : > { %v687_v42 = vadd.f32 %v686_v41, %v613_v38 }
 0x2d0   : > { %v691_v43 = vcombine.low %v685_v40, %v687_v42 }
 0x2d2   : > { %693 = vst [vmem:[%s296_s21] sm:$0xff] %v691_v43 }
 0x2d3   : > { %902 = shalt.err (!%p899_p5)
}
 0x2d4   : > { %s903_s16 = scalar_lea.hbm %s1149_s30, 128  ;;  %s907_s19 = scalar_lea.hbm %s1203_s7, 256 }
 0x2d5   : > { %p904_p6 = scmp.ne.s32.totalorder %s1149_s30, %s903_s16  ;;  %p908_p10 = scmp.lt.u32.totalorder %s1149_s30, %s1203_s7 }
 0x2d6   : > { %p909_p11 = scmp.lt.u32.totalorder %s907_s19, %s903_s16  ;;  %p911_p13 = scmp.lt.u32.totalorder %s903_s16, %s1149_s30 }
 0x2d7   : > { %p905_p7 = pnand %p904_p6, %p1052_p4 }
 0x2d8   : > { %p910_p12 = por %p909_p11, %p908_p10 }
 0x2d9   : > { %p906_p9 = pneg %p905_p7 }
 0x2da   : > { %p912_p0 = por %p911_p13, %p910_p12 }
 0x2dc   : > { %p913_p1 = pnand %p912_p0, %p906_p9 }
 0x2de   : > { %916 = shalt.err (!%p913_p1)
}
 0x2df   : > { %829 = dma.vmem_to_hbm [thread:$0]  (%p1052_p4), %s1151_s20, 128, %s1149_s30, %s695_s8  }
 0x2e0 PF: > { %p835_p2 = scmp.ge.s32.totalorder %s967_s29, 2  ;;  %s723_s23 = sand.u32 1, %s947_s24  }
 0x2e1   : > { %s724_s10 = scalar_lea.sflag [#allocation3], %s723_s23 }
 0x2e2   : > { %p832_p3 = pnand %p835_p2, %p1059_p8 }
 0x2e4   : > { %942 = dma.done.wait (!%p832_p3), %s724_s10, 128  }
 0x2e5   : > { %944 = vsyncadd (!%p832_p3), %s724_s10, 4294967168  ;;  %s20_s29 = sadd.s32 1, %s967_s29   ;;  %s1206_s24 = smov %s951_s25 }
 0x2e6   : > { %p17_p5 = scmp.ge.s32.totalorder %s20_s29, 4   ;;  %s1207_s25 = smov %s955_s26 }
 0x2e7   : > { %s1208_s26 = smov %s1065_s14  ;;  %s1209_s27 = smov %s963_s28 }
 0x2e8   : > { %s1210_s28 = smov %s1212_s9  ;;  %19 = sbr.rel (!%p17_p5) target bundleno = 4 (0x4), region = 83 }
 0x2ef   :  { %729 = vsyncpa [#allocation3], 1 }
 0x2f0   :  { %731 = vsyncpa [#allocation3 + $0x1], 1 }

// kernel: tpu_custom_call.1
= control target key start
LH: loop header
LB: loop body
LE: loop exit
PB: predicated region body
PF: predicated region fallthrough
CT: control target
= control target key end

     0   :  { %12 = vsyncpa [#allocation3], 0  ;;  %s1196_s0 = inlined_call_operand.vmem [shape: f32[2,4,256], index: 0, kind: input, shape index: {}]   ;;  %s1197_s1 = inlined_call_operand.vmem [shape: f32[32,4], index: 1, kind: input, shape index: {}]   ;;  %s1198_s2 = inlined_call_operand.vmem [shape: f32[32,1], index: 2, kind: input, shape index: {}]   ;;  %s1199_s3 = inlined_call_operand.vmem [shape: f32[32,32], index: 3, kind: input, shape index: {}]   ;;  %s1200_s4 = inlined_call_operand.vmem [shape: f32[32,1], index: 4, kind: input, shape index: {}]   ;;  %s1201_s5 = inlined_call_operand.vmem [shape: f32[4,32], index: 5, kind: input, shape index: {}]   ;;  %s1202_s6 = inlined_call_operand.vmem [shape: f32[4,1], index: 6, kind: input, shape index: {}]   ;;  %s1203_s7 = inlined_call_operand.hbm [shape: f32[2,4,256], index: 7, kind: output, shape index: {}]  }
   0x1   :  { %14 = vsyncpa [#allocation3 + $0x1], 0  ;;  %s1012_s24 = smov 0   ;;  %s1014_s25 = smov 0  }
   0x2   :  { %s1016_s26 = smov 0   ;;  %s1018_s27 = smov 0  }
   0x3   :  { %s1020_s28 = smov 0   ;;  %s1022_s29 = smov 0  }
   0x4 LB: > { %s787_s30 = sadd.s32 4294967295, %s967_s29   ;;  %s788_s8 = sadd.s32 4294967294, %s967_s29   ;;  %s967_s29 = sphi %s1022_s29, %s20_s29   ;;  %s963_s28 = sphi %s1020_s28, %s1210_s28   ;;  %s959_s27 = sphi %s1018_s27, %s1209_s27   ;;  %s955_s26 = sphi %s1016_s26, %s1208_s26   ;;  %s951_s25 = sphi %s1014_s25, %s1207_s25   ;;  %s947_s24 = sphi %s1012_s24, %s1206_s24  }
   0x5   : > { %s32_s9 = sadd.s32 1, %s963_s28  ;;  %s195_s10 = sadd.s32 1, %s955_s26 }
   0x6   : > { %p34_p0 = scmp.ge.s32.totalorder %s32_s9, 2  ;;  %p205_p1 = scmp.ne.s32.totalorder %s955_s26, %s951_s25 }
   0x7   : > { %p206_p2 = scmp.eq.s32.totalorder %s787_s30, 1  ;;  %p211_p3 = scmp.ne.s32.totalorder %s951_s25, %s947_s24 }
   0x8   : > { %s1212_s9 = smov (%p34_p0, %s32_s9), 0  ;;  %p212_p5 = scmp.eq.s32.totalorder %s788_s8, 1 }
   0x9   : > { %p1052_p4 = por %p206_p2, %p205_p1  ;;  %s190_s12 = ssub.s32 %s963_s28, %s1212_s9 }
   0xa   : > { %p791_p6 = scmp.ge.s32.totalorder %s967_s29, 1  ;;  %p193_p7 = scmp.eq.s32.totalorder %s190_s12, 0 }
   0xb   : > { %p1059_p8 = por %p212_p5, %p211_p3  ;;  %p261_p9 = scmp.lt.s32.totalorder %s967_s29, 3 }
   0xc   : > { %s1065_s14 = scalar_select %p193_p7, %s955_s26, %s195_s10  }
   0xd   : > { %p262_p10 = pnand %p791_p6, %p261_p9 }
   0xe   : > { %p298_p11 = scmp.lt.s32.totalorder (!%p262_p10), %s959_s27, 1  ;;  %v969_v0 = vmov (!%p262_p10), 0.0   ;;  %v313_v1 = vld [vmem:[%s1198_s2] sm:$0xff] (!%p262_p10)  ;;  %v970_v2 = vmov (!%p262_p10), 0   ;;  %v315_v3 = vld [vmem:[%s1198_s2 + $0x10] sm:$0xff] (!%p262_p10)  ;;  %v314_v4 = vld [vmem:[%s1198_s2 + $0x8] sm:$0xff] (!%p262_p10) }
   0xf   : > { %265 = sbr.rel (%p262_p10) target bundleno = 736 (0x2e0), region = 48  ;;  %421 = vmatprep.mubr.f32.mxu0 (!%p262_p10), %v969_v0  ;;  %567 = vmatprep.mubr.f32.mxu1 (!%p262_p10), %v969_v0  ;;  %v316_v5 = vld [vmem:[%s1198_s2 + $0x18] sm:$0xff] (!%p262_p10)  ;;  %vm352_vm0 = vcmask (!%p262_p10), 1043456   ;;  %v309_v8 = vld [vmem:[%s1197_s1] sm:$0xff] (!%p262_p10)  ;;  %vm339_vm1 = vcmask (!%p262_p10), 31744   ;;  %v467_v10 = vld [vmem:[%s1200_s4 + $0x8] sm:$0xff] (!%p262_p10) }
  0x10   : > { %886 = vset.pattern.permute.xlu0 (!%p262_p10), %v970_v2  ;;  %887 = vset.pattern.permute.xlu1 (!%p262_p10), %v970_v2  ;;  %v466_v9 = vld [vmem:[%s1200_s4] sm:$0xff] (!%p262_p10)  ;;  %v310_v11 = vld [vmem:[%s1197_s1 + $0x8] sm:$0xff] (!%p262_p10)  ;;  %v468_v12 = vld [vmem:[%s1200_s4 + $0x10] sm:$0xff] (!%p262_p10)  ;;  %vm490_vm2 = vcmask (!%p262_p10), 261120   ;;  %s812_s19 = sshll.u32 (!%p262_p10), %s959_s27, 7 }
  0x11   : > { %319 = vperm.xlu0 (!%p262_p10), %886, %v313_v1   ;;  %329 = vperm.xlu1 (!%p262_p10), %887, %v315_v3   ;;  %v469_v13 = vld [vmem:[%s1200_s4 + $0x18] sm:$0xff] (!%p262_p10)  ;;  %v311_v14 = vld [vmem:[%s1197_s1 + $0x10] sm:$0xff] (!%p262_p10)  ;;  %v609_v15 = vld [vmem:[%s1202_s6] sm:$0xf] (!%p262_p10)  ;;  %s1149_s30 = scalar_lea.hbm (!%p262_p10), %s1203_s7, %s812_s19 }
  0x12   : > { %v312_v16 = vld [vmem:[%s1197_s1 + $0x18] sm:$0xff] (!%p262_p10)  ;;  %v462_v57 = vld [vmem:[%s1199_s3] sm:$0xff] (!%p262_p10)  ;;  %v463_v58 = vld [vmem:[%s1199_s3 + $0x8] sm:$0xff] (!%p262_p10) }
  0x13   : > { %v464_v59 = vld [vmem:[%s1199_s3 + $0x10] sm:$0xff] (!%p262_p10)  ;;  %v465_v60 = vld [vmem:[%s1199_s3 + $0x18] sm:$0xff] (!%p262_p10) }
  0x15   : > { %324 = vperm.xlu0 (!%p262_p10), %886, %v314_v4   ;;  %334 = vperm.xlu1 (!%p262_p10), %887, %v316_v5  }
  0x16   : > { %s299_s17 = scalar_select %p298_p11, %s959_s27, 1 }
  0x17   : > { %s971_s27 = smov [#allocation2]  }
  0x18   : > { %s811_s20 = sshll.u32 %s299_s17, 3  ;;  %s294_s17 = sand.u32 1, %s951_s25  }
  0x19   : > { %s305_s12 = scalar_lea.vmem %s1196_s0, %s811_s20  ;;  %472 = vperm.xlu0 %886, %v466_v9   ;;  %477 = vperm.xlu1 %887, %v467_v10   ;;  %s792_s18 = sshll.u32 %s294_s17, 3 }
  0x1a   : > { %v308_v6 = vld [vmem:[%s305_s12] sm:$0xff]  ;;  %s296_s21 = scalar_lea.vmem [#allocation2], %s792_s18  ;;  %s695_s8 = scalar_lea.sflag [#allocation3], %s294_s17 }
  0x1b   : > { %v338_v7 = vcombine.high %v308_v6, %v308_v6  ;;  %s711_s20 = sshll.u32 %s296_s21, 4  ;;  %s893_s12 = sshll.u32 %s971_s27, 4  ;;  %s1151_s20 = int_to_ptr.vmem [resolvable:$true] %s711_s20  ;;  %s894_s12 = int_to_ptr.vmem [resolvable:$false] %s893_s12 }
  0x1c   : > { %s889_s10 = scalar_lea.vmem %s1151_s20, 128  ;;  %s895_s15 = scalar_lea.vmem %s894_s12, 256 }
  0x1d   : > { %795 = vmatprep.subr.msk.mxu0 %vm352_vm0, %v338_v7  ;;  %482 = vperm.xlu0 %886, %v468_v12   ;;  %p890_p12 = scmp.ne.s32.totalorder %s1151_s20, %s889_s10  ;;  %p896_p1 = scmp.lt.s32.totalorder %s1151_s20, %s894_s12 }
  0x1e   : > { %796 = vmatpush1.msk.msra.mxu0 %vm352_vm0, %v308_v6  ;;  %487 = vperm.xlu1 %887, %v469_v13   ;;  %p897_p2 = scmp.lt.s32.totalorder %s895_s15, %s889_s10 }
  0x1f   : > { %797 = vmatmul.mubr.msk.f32.vlgmr.msra.gmra.mrb[0].mxu0 %vm339_vm1, %v309_v8  ;;  %p891_p13 = pnand %p890_p12, %p1052_p4 }
  0x20   : > { %427 = vmatprep.mubr.f32.mxu0 %v969_v0  ;;  %p898_p3 = por %p897_p2, %p896_p1 }
  0x21   : > { %612 = vperm.xlu0 %886, %v609_v15   ;;  %p892_p0 = pneg %p891_p13 }
  0x23   : > { %798 = vmatmul.mubr.msk.f32.gmra.mrb[2].mxu0 %vm339_vm1, %v310_v11  ;;  %p899_p5 = pnand %p898_p3, %p892_p0 }
  0x24   : > { %433 = vmatprep.mubr.f32.mxu0 %v969_v0 }
  0x27   : > { %799 = vmatmul.mubr.msk.f32.gmra.mrb[4].mxu0 %vm339_vm1, %v311_v14 }
  0x28   : > { %439 = vmatprep.mubr.f32.mxu0 %v969_v0 }
  0x2b   : > { %800 = vmatmul.mubr.msk.f32.gmra.mrb[6].mxu0 %vm339_vm1, %v312_v16 }
  0x2c   : > { %682 = vmatprep.mubr.f32.mxu0 %v969_v0 }
  0x90   : > { %v320_v17 = vpop.permute.xlu0 %319  ;;  %v330_v27 = vpop.permute.xlu1 %329 }
  0x94   : > { %v325_v22 = vpop.permute.xlu0 %324  ;;  %v335_v41 = vpop.permute.xlu1 %334 }
  0x98   : > { %v473_v61 = vpop.permute.xlu0 %472  ;;  %v478_v3 = vpop.permute.xlu1 %477 }
  0xf2   : > { %v423_v18 = vpop.f32.mrb[0].mxu0 }
  0xf3   : > { %v424_v19 = vadd.f32 %v423_v18, %v320_v17  ;;  %v425_v20 = vpop.f32.mrb[1].mxu0 }
  0xf4   : > { %v426_v21 = vadd.f32 %v425_v20, %v320_v17 }
  0xf5   : > { %v446_v24 = vmul.f32 0.01, %v424_v19 }
  0xf6   : > { %v429_v23 = vpop.f32.mrb[2].mxu0  ;;  %v447_v28 = vmul.f32 0.01, %v426_v21 }
  0xf7   : > { %v430_v25 = vadd.f32 %v429_v23, %v325_v22  ;;  %v431_v26 = vpop.f32.mrb[3].mxu0  ;;  %v454_v33 = vmax.f32 %v424_v19, %v446_v24 }
  0xf8   : > { %v432_v29 = vadd.f32 %v431_v26, %v325_v22  ;;  %v455_v38 = vmax.f32 %v426_v21, %v447_v28  ;;  %v488_v21 = vpop.permute.xlu1 %487 }
  0xf9   : > { %v448_v30 = vmul.f32 0.01, %v430_v25 }
  0xfa   : > { %v449_v31 = vmul.f32 0.01, %v432_v29  ;;  %v435_v32 = vpop.f32.mrb[4].mxu0 }
  0xfb   : > { %v456_v34 = vmax.f32 %v430_v25, %v448_v30  ;;  %v436_v35 = vadd.f32 %v435_v32, %v330_v27  ;;  %v437_v36 = vpop.f32.mrb[5].mxu0 }
  0xfc   : > { %v438_v37 = vadd.f32 %v437_v36, %v330_v27  ;;  %v457_v39 = vmax.f32 %v432_v29, %v449_v31 }
  0xfd   : > { %v815_v40 = vpack.c.bf16 %v456_v34, %v454_v33  ;;  %v450_v44 = vmul.f32 0.01, %v436_v35 }
  0xfe   : > { %v441_v42 = vpop.f32.mrb[6].mxu0  ;;  %v813_v43 = vpack.c.bf16 %v457_v39, %v455_v38  ;;  %v451_v47 = vmul.f32 0.01, %v438_v37 }
  0xff   : > { %v442_v45 = vadd.f32 %v441_v42, %v335_v41  ;;  %v443_v46 = vpop.f32.mrb[7].mxu0  ;;  %v458_v51 = vmax.f32 %v436_v35, %v450_v44 }
 0x100   : > { %v444_v48 = vadd.f32 %v443_v46, %v335_v41  ;;  %814 = vmatprep.subr.bf16.mxu1 %v813_v43  ;;  %v459_v53 = vmax.f32 %v438_v37, %v451_v47  ;;  %v608_v37 = vld [vmem:[%s1201_s5] sm:$0xf] }
 0x101   : > { %v452_v49 = vmul.f32 0.01, %v442_v45  ;;  %816 = vmatpush1.bf16.msra.mxu1 %v815_v40 }
 0x102   : > { %v453_v50 = vmul.f32 0.01, %v444_v48 }
 0x103   : > { %v460_v52 = vmax.f32 %v442_v45, %v452_v49 }
 0x104   : > { %v461_v54 = vmax.f32 %v444_v48, %v453_v50 }
 0x105   : > { %v819_v55 = vpack.c.bf16 %v460_v52, %v458_v51 }
 0x106   : > { %v817_v56 = vpack.c.bf16 %v461_v54, %v459_v53 }
 0x108   : > { %818 = vmatprep.subr.bf16.mxu1 %v817_v56 }
 0x109   : > { %820 = vmatpush1.bf16.msra.mxu1 %v819_v55 }
 0x10c   : > { %801 = vmatmul.mubr.msk.f32.vlgmr.msra.gmra.mrb[0].mxu1 %vm490_vm2, %v462_v57 }
 0x10d   : > { %573 = vmatprep.mubr.f32.mxu1 %v969_v0 }
 0x110   : > { %802 = vmatmul.mubr.msk.f32.gmra.mrb[2].mxu1 %vm490_vm2, %v463_v58 }
 0x111   : > { %579 = vmatprep.mubr.f32.mxu1 %v969_v0 }
 0x114   : > { %803 = vmatmul.mubr.msk.f32.gmra.mrb[4].mxu1 %vm490_vm2, %v464_v59 }
 0x115   : > { %585 = vmatprep.mubr.f32.mxu1 %v969_v0  ;;  %v483_v0 = vpop.permute.xlu0 %482 }
 0x118   : > { %804 = vmatmul.mubr.msk.f32.gmra.mrb[6].mxu1 %vm490_vm2, %v465_v60 }
 0x119   : > { %v613_v38 = vpop.permute.xlu0 %612 }
 0x1df   : > { %v569_v62 = vpop.f32.mrb[0].mxu1 }
 0x1e0   : > { %v570_v63 = vadd.f32 %v569_v62, %v473_v61  ;;  %v571_v1 = vpop.f32.mrb[1].mxu1 }
 0x1e1   : > { %v572_v2 = vadd.f32 %v571_v1, %v473_v61 }
 0x1e2   : > { %v592_v5 = vmul.f32 0.01, %v570_v63 }
 0x1e3   : > { %v575_v4 = vpop.f32.mrb[2].mxu1  ;;  %v593_v8 = vmul.f32 0.01, %v572_v2 }
 0x1e4   : > { %v576_v6 = vadd.f32 %v575_v4, %v478_v3  ;;  %v577_v7 = vpop.f32.mrb[3].mxu1  ;;  %v600_v13 = vmax.f32 %v570_v63, %v592_v5 }
 0x1e5   : > { %v578_v9 = vadd.f32 %v577_v7, %v478_v3  ;;  %v601_v17 = vmax.f32 %v572_v2, %v593_v8 }
 0x1e6   : > { %v594_v10 = vmul.f32 0.01, %v576_v6 }
 0x1e7   : > { %v595_v11 = vmul.f32 0.01, %v578_v9  ;;  %v581_v12 = vpop.f32.mrb[4].mxu1 }
 0x1e8   : > { %v602_v14 = vmax.f32 %v576_v6, %v594_v10  ;;  %v582_v15 = vadd.f32 %v581_v12, %v483_v0  ;;  %v583_v16 = vpop.f32.mrb[5].mxu1 }
 0x1e9   : > { %v603_v18 = vmax.f32 %v578_v9, %v595_v11  ;;  %v584_v19 = vadd.f32 %v583_v16, %v483_v0 }
 0x1ea   : > { %v823_v20 = vpack.c.bf16 %v602_v14, %v600_v13  ;;  %v596_v24 = vmul.f32 0.01, %v582_v15 }
 0x1eb   : > { %v587_v22 = vpop.f32.mrb[6].mxu1  ;;  %v821_v23 = vpack.c.bf16 %v603_v18, %v601_v17  ;;  %v597_v27 = vmul.f32 0.01, %v584_v19 }
 0x1ec   : > { %v588_v25 = vadd.f32 %v587_v22, %v488_v21  ;;  %v589_v26 = vpop.f32.mrb[7].mxu1  ;;  %v604_v31 = vmax.f32 %v582_v15, %v596_v24 }
 0x1ed   : > { %v590_v28 = vadd.f32 %v589_v26, %v488_v21  ;;  %822 = vmatprep.subr.bf16.mxu0 %v821_v23  ;;  %v605_v33 = vmax.f32 %v584_v19, %v597_v27 }
 0x1ee   : > { %v598_v29 = vmul.f32 0.01, %v588_v25  ;;  %824 = vmatpush1.bf16.msra.mxu0 %v823_v20 }
 0x1ef   : > { %v599_v30 = vmul.f32 0.01, %v590_v28 }
 0x1f0   : > { %v606_v32 = vmax.f32 %v588_v25, %v598_v29 }
 0x1f1   : > { %v607_v34 = vmax.f32 %v590_v28, %v599_v30 }
 0x1f2   : > { %v827_v35 = vpack.c.bf16 %v606_v32, %v604_v31 }
 0x1f3   : > { %v825_v36 = vpack.c.bf16 %v607_v34, %v605_v33 }
 0x1f5   : > { %826 = vmatprep.subr.bf16.mxu0 %v825_v36 }
 0x1f6   : > { %828 = vmatpush1.bf16.msra.mxu0 %v827_v35 }
 0x1f9   : > { %805 = vmatmul.mubr.msk.f32.vlgmr.msra.gmra.mrb[8].mxu0 %vm490_vm2, %v608_v37 }
 0x2cc   : > { %v684_v39 = vpop.f32.mrb[8].mxu0 }
 0x2cd   : > { %v685_v40 = vadd.f32 %v684_v39, %v613_v38  ;;  %v686_v41 = vpop.f32.mrb[9].mxu0 }
 0x2ce   : > { %v687_v42 = vadd.f32 %v686_v41, %v613_v38 }
 0x2d0   : > { %v691_v43 = vcombine.low %v685_v40, %v687_v42 }
 0x2d2   : > { %693 = vst [vmem:[%s296_s21] sm:$0xff] %v691_v43 }
 0x2d3   : > { %902 = shalt.err (!%p899_p5)
}
 0x2d4   : > { %s903_s16 = scalar_lea.hbm %s1149_s30, 128  ;;  %s907_s19 = scalar_lea.hbm %s1203_s7, 256 }
 0x2d5   : > { %p904_p6 = scmp.ne.s32.totalorder %s1149_s30, %s903_s16  ;;  %p908_p10 = scmp.lt.u32.totalorder %s1149_s30, %s1203_s7 }
 0x2d6   : > { %p909_p11 = scmp.lt.u32.totalorder %s907_s19, %s903_s16  ;;  %p911_p13 = scmp.lt.u32.totalorder %s903_s16, %s1149_s30 }
 0x2d7   : > { %p905_p7 = pnand %p904_p6, %p1052_p4 }
 0x2d8   : > { %p910_p12 = por %p909_p11, %p908_p10 }
 0x2d9   : > { %p906_p9 = pneg %p905_p7 }
 0x2da   : > { %p912_p0 = por %p911_p13, %p910_p12 }
 0x2dc   : > { %p913_p1 = pnand %p912_p0, %p906_p9 }
 0x2de   : > { %916 = shalt.err (!%p913_p1)
}
 0x2df   : > { %829 = dma.vmem_to_hbm [thread:$0]  (%p1052_p4), %s1151_s20, 128, %s1149_s30, %s695_s8  }
 0x2e0 PF: > { %p835_p2 = scmp.ge.s32.totalorder %s967_s29, 2  ;;  %s723_s23 = sand.u32 1, %s947_s24  }
 0x2e1   : > { %s724_s10 = scalar_lea.sflag [#allocation3], %s723_s23 }
 0x2e2   : > { %p832_p3 = pnand %p835_p2, %p1059_p8 }
 0x2e4   : > { %942 = dma.done.wait (!%p832_p3), %s724_s10, 128  }
 0x2e5   : > { %944 = vsyncadd (!%p832_p3), %s724_s10, 4294967168  ;;  %s20_s29 = sadd.s32 1, %s967_s29   ;;  %s1206_s24 = smov %s951_s25 }
 0x2e6   : > { %p17_p5 = scmp.ge.s32.totalorder %s20_s29, 4   ;;  %s1207_s25 = smov %s955_s26 }
 0x2e7   : > { %s1208_s26 = smov %s1065_s14  ;;  %s1209_s27 = smov %s963_s28 }
 0x2e8   : > { %s1210_s28 = smov %s1212_s9  ;;  %19 = sbr.rel (!%p17_p5) target bundleno = 4 (0x4), region = 83 }
 0x2ef   :  { %729 = vsyncpa [#allocation3], 1 }
 0x2f0   :  { %731 = vsyncpa [#allocation3 + $0x1], 1 }

</bundles_post_ra>
